<compile_context>
chip_gen: v7x
topology: tpu7x:2x2x1
jax: 0.10.0
libtpu: 0.0.40
codegen_flags: <defaults>
</compile_context>

<pallas_src>
import functools
import math
import numpy as np
import jax
import jax.numpy as jnp
from jax.experimental import pallas as pl
from jax.experimental.pallas import tpu as pltpu


# ----------------------------------------------------------------------------
# Small in-kernel helpers (pure jnp, shared by kernels)
# ----------------------------------------------------------------------------


def _ln(x, g, b, eps=1e-5):
    mu = jnp.mean(x, axis=-1, keepdims=True)
    var = jnp.mean((x - mu) ** 2, axis=-1, keepdims=True)
    return (x - mu) * jax.lax.rsqrt(var + eps) * g + b


def _esa_pool_project(x, keep, g, b, w, bw, w1, b1, pw, pb):
    # LayerNorm -> linear -> linear1 -> mask-fill(-10000) -> softmax over tokens
    # -> mask-fill(0) -> sum(attn * cap) -> final projection.
    mu = jnp.mean(x, axis=-1, keepdims=True)
    var = jnp.mean((x - mu) ** 2, axis=-1, keepdims=True)
    xn = (x - mu) * jax.lax.rsqrt(var + 1e-5) * g + b
    cap = jnp.dot(xn, w, preferred_element_type=jnp.float32) + bw
    feat = jnp.dot(cap, w1, preferred_element_type=jnp.float32) + b1
    feat = jnp.where(keep, feat, -10000.0)
    fmax = jnp.max(feat, axis=0, keepdims=True)
    e = jnp.exp(feat - fmax)
    attn = e / jnp.sum(e, axis=0, keepdims=True)         # exact division
    attn = jnp.where(keep, attn, 0.0)
    pooled = jnp.sum(attn * cap, axis=0, keepdims=True)  # (1, D)
    return jnp.dot(pooled, pw, preferred_element_type=jnp.float32) + pb


def _const_block(arr):
    """Full-array block with a constant index map (arity-safe for prefetch)."""
    nd = arr.ndim

    def idx(*_, _nd=nd):
        return (0,) * _nd

    return pl.BlockSpec(arr.shape, idx)


# ----------------------------------------------------------------------------
# Kernel 1: GINE MLP  (Linear -> ReLU -> Linear), M-tiled, grid "parallel".
# BatchNorm (training-mode batch statistics) is applied in plain JAX outside.
# ----------------------------------------------------------------------------


def _gine_mlp_kernel(a_ref, w1_ref, b1_ref, w2_ref, b2_ref, o_ref):
    hid = jnp.maximum(
        jnp.dot(a_ref[...], w1_ref[...], preferred_element_type=jnp.float32)
        + b1_ref[...], 0.0)
    o_ref[...] = (jnp.dot(hid, w2_ref[...], preferred_element_type=jnp.float32)
                  + b2_ref[...]).astype(o_ref.dtype)


def pallas_gine_mlp(aggr, w1, b1, w2, b2):
    M, K = aggr.shape
    H = w1.shape[1]
    N = w2.shape[1]
    bm = M
    for cand in (512, 256, 128, 64, 32, 16, 8):
        if M % cand == 0:
            bm = cand
            break
    return pl.pallas_call(
        _gine_mlp_kernel,
        out_shape=jax.ShapeDtypeStruct((M, N), aggr.dtype),
        grid=(M // bm,),
        in_specs=[
            pl.BlockSpec((bm, K), lambda i: (i, 0)),
            pl.BlockSpec((K, H), lambda i: (0, 0)),
            pl.BlockSpec((1, H), lambda i: (0, 0)),
            pl.BlockSpec((H, N), lambda i: (0, 0)),
            pl.BlockSpec((1, N), lambda i: (0, 0)),
        ],
        out_specs=pl.BlockSpec((bm, N), lambda i: (i, 0)),
        compiler_params=pltpu.CompilerParams(
            dimension_semantics=("parallel",),
            vmem_limit_bytes=32 * 1024 * 1024),
    )(aggr, w1, b1.reshape(1, H), w2, b2.reshape(1, N))


# ----------------------------------------------------------------------------
# Kernel 2: fully fused MS branch (per batch element)
#   input_compress -> n_attn_layers post-norm encoder layers -> ESA_SPEC -> proj
# TODO(synk): nn_utils.TransformerEncoderLayer is external; implemented as a
# standard post-norm encoder layer (vanilla MHA, additive_attn/pairwise off).
# ----------------------------------------------------------------------------


def _ms_branch_kernel(npk_ref, peak_ref, comp_w_ref, comp_b_ref,
                      wq_ref, wk_ref, wv_ref, bq_ref, bk_ref, bv_ref,
                      wo_ref, bo_ref, ff1_w_ref, ff1_b_ref, ff2_w_ref, ff2_b_ref,
                      n1_g_ref, n1_b_ref, n2_g_ref, n2_b_ref,
                      eg_ref, eb_ref, ew_ref, ewb_ref, ew1_ref, eb1_ref,
                      pw_ref, pb_ref, o_ref, *, nhead, n_layers):
    f32 = jnp.float32
    b = pl.program_id(0)
    n_valid = npk_ref[b]

    # input_compress (K padded to a sublane multiple in the wrapper)
    x = jnp.dot(peak_ref[0], comp_w_ref[...],
                preferred_element_type=f32) + comp_b_ref[...]
    P, d = x.shape
    hd = d // nhead
    scale = 1.0 / math.sqrt(hd)

    # Key-padding mask built in-kernel; hoisted once to a dense (P, P) additive
    # bias (JAX does not CSE broadcast_in_dim).  Finite -1e30 avoids NaN when a
    # row is fully masked.
    key_pad = jax.lax.broadcasted_iota(jnp.int32, (1, P), 1) >= n_valid
    mask_bias = jnp.broadcast_to(
        jnp.where(key_pad, f32(-1e30), f32(0.0)), (P, P))

    for l in range(n_layers):
        # Per-head attention via head-major weight panels -> no minor-dim
        # (lane) slicing.  concat(heads) @ Wout == sum_h head_h @ Wout[h].
        # TODO(synk): for large P convert to lax.fori_loop over a head-leading
        # scratch so the (P,P) score tensors are not all simultaneously live.
        acc = jnp.zeros((P, d), f32)
        for h in range(nhead):
            qh = (jnp.dot(x, wq_ref[l, h], preferred_element_type=f32)
                  + bq_ref[l, h]) * scale
            kh = jnp.dot(x, wk_ref[l, h], preferred_element_type=f32) + bk_ref[l, h]
            vh = jnp.dot(x, wv_ref[l, h], preferred_element_type=f32) + bv_ref[l, h]
            s = jax.lax.dot_general(qh, kh, (((1,), (1,)), ((), ())),
                                    preferred_element_type=f32) + mask_bias
            m = jnp.max(s, axis=-1, keepdims=True)
            e = jnp.exp(s - m)
            a = e / jnp.sum(e, axis=-1, keepdims=True)            # exact division
            oh = jnp.dot(a, vh, preferred_element_type=f32)       # (P, hd)
            acc = acc + jnp.dot(oh, wo_ref[l, h], preferred_element_type=f32)
        attn_out = acc + bo_ref[l]

        y = _ln(x + attn_out, n1_g_ref[l], n1_b_ref[l])
        ff = jnp.maximum(
            jnp.dot(y, ff1_w_ref[l], preferred_element_type=f32) + ff1_b_ref[l], 0.0)
        ff = jnp.dot(ff, ff2_w_ref[l], preferred_element_type=f32) + ff2_b_ref[l]
        x = _ln(y + ff, n2_g_ref[l], n2_b_ref[l])

    # ESA_SPEC pooling + projection.  NOTE: reproduces the original module
    # exactly — masked_fill(mask==0, ...) with the *padding* mask pools over the
    # padding positions (j >= num_peaks).
    keep = jax.lax.broadcasted_iota(jnp.int32, (P, 1), 0) >= n_valid
    o_ref[...] = _esa_pool_project(
        x, keep, eg_ref[...], eb_ref[...], ew_ref[...], ewb_ref[...],
        ew1_ref[...], eb1_ref[...], pw_ref[...], pb_ref[...]).astype(o_ref.dtype)


def _build_encoder_stacks(p):
    """Stack per-layer encoder weights; q/k/v/out reshaped head-major."""
    d = p["spec_embed_dim"]
    H = p["nhead"]
    hd = d // H
    L = len(p["layers"])
    st = lambda k: jnp.stack([lp[k] for lp in p["layers"]])
    in_w = st("in_w")                       # (L, d, 3d)
    in_b = st("in_b")                       # (L, 3d)

    def head_w(w):                          # (L, d, d) -> (L, H, d, hd)
        return w.reshape(L, d, H, hd).transpose(0, 2, 1, 3)

    def head_b(b):                          # (L, d) -> (L, H, 1, hd)
        return b.reshape(L, H, 1, hd)

    return {
        "wq": head_w(in_w[:, :, 0:d]), "wk": head_w(in_w[:, :, d:2 * d]),
        "wv": head_w(in_w[:, :, 2 * d:3 * d]),
        "bq": head_b(in_b[:, 0:d]), "bk": head_b(in_b[:, d:2 * d]),
        "bv": head_b(in_b[:, 2 * d:3 * d]),
        "wo": st("out_w").reshape(L, H, hd, d),
        "bo": st("out_b").reshape(L, 1, d),
        "ff1_w": st("ff1_w"), "ff1_b": st("ff1_b").reshape(L, 1, 4 * d),
        "ff2_w": st("ff2_w"), "ff2_b": st("ff2_b").reshape(L, 1, d),
        "n1_g": st("n1_g").reshape(L, 1, d), "n1_b": st("n1_b").reshape(L, 1, d),
        "n2_g": st("n2_g").reshape(L, 1, d), "n2_b": st("n2_b").reshape(L, 1, d),
    }


def pallas_ms_branch(peak_padded, num_peaks, p, esa, proj_w, proj_b):
    """peak_padded:(B,P,Kp) fourier+intensity (K zero-padded), num_peaks:(B,).
    Returns (B, Dout) spec features (ESA-pooled + projected)."""
    B, P, Kp = peak_padded.shape
    d = p["spec_embed_dim"]
    H = p["nhead"]
    L = len(p["layers"])
    D = esa["w"].shape[1]
    Dout = proj_w.shape[1]
    Dpad = ((Dout + 127) // 128) * 128       # lane-dense output store
    pw = jnp.pad(proj_w, ((0, 0), (0, Dpad - Dout))) if Dpad != Dout else proj_w
    pb = jnp.pad(proj_b, ((0, Dpad - Dout),)) if Dpad != Dout else proj_b

    comp_w = p["comp_w"]
    comp_w = jnp.pad(comp_w, ((0, Kp - comp_w.shape[0]), (0, 0)))  # zero rows: identical math

    s = _build_encoder_stacks(p)
    args = [peak_padded, comp_w, p["comp_b"].reshape(1, d),
            s["wq"], s["wk"], s["wv"], s["bq"], s["bk"], s["bv"],
            s["wo"], s["bo"], s["ff1_w"], s["ff1_b"], s["ff2_w"], s["ff2_b"],
            s["n1_g"], s["n1_b"], s["n2_g"], s["n2_b"],
            esa["ln_g"].reshape(1, d), esa["ln_b"].reshape(1, d),
            esa["w"], esa["b"].reshape(1, D), esa["w1"], esa["b1"].reshape(1, D),
            pw, pb.reshape(1, Dpad)]

    in_specs = [pl.BlockSpec((1, P, Kp), lambda b, npk: (b, 0, 0))]
    in_specs += [_const_block(a) for a in args[1:]]

    gs = pltpu.PrefetchScalarGridSpec(
        num_scalar_prefetch=1, grid=(B,),
        in_specs=in_specs,
        out_specs=pl.BlockSpec((1, Dpad), lambda b, npk: (b, 0)))

    out = pl.pallas_call(
        functools.partial(_ms_branch_kernel, nhead=H, n_layers=L),
        out_shape=jax.ShapeDtypeStruct((B, Dpad), peak_padded.dtype),
        grid_spec=gs,
        compiler_params=pltpu.CompilerParams(
            dimension_semantics=("parallel",),
            vmem_limit_bytes=32 * 1024 * 1024),
    )(num_peaks.astype(jnp.int32), *args)
    return out[:, :Dout]


# ----------------------------------------------------------------------------
# Kernel 3: fused ESA_SMILES pooling + final projection (per batch element)
# ----------------------------------------------------------------------------


def _esa_smi_kernel(x_ref, g_ref, be_ref, w_ref, b_ref, w1_ref, b1_ref,
                    pw_ref, pb_ref, o_ref):
    x = x_ref[0]                                                  # (N, C)
    # attention_mask = (result != 0).any(dim=-1), derived in-kernel (no mask DMA)
    keep = jnp.max(jnp.abs(x), axis=-1, keepdims=True) > 0.0      # (N, 1)
    o_ref[...] = _esa_pool_project(
        x, keep, g_ref[...], be_ref[...], w_ref[...], b_ref[...],
        w1_ref[...], b1_ref[...], pw_ref[...], pb_ref[...]).astype(o_ref.dtype)


def pallas_esa_smi_proj(x, p, proj_w, proj_b):
    """x:(B,N,C) packed node features.  Returns (B, Dout)."""
    B, N, C = x.shape
    D = p["w"].shape[1]
    Dout = proj_w.shape[1]
    Dpad = ((Dout + 127) // 128) * 128       # lane-dense output store
    pw = jnp.pad(proj_w, ((0, 0), (0, Dpad - Dout))) if Dpad != Dout else proj_w
    pb = jnp.pad(proj_b, ((0, Dpad - Dout),)) if Dpad != Dout else proj_b
    cst = lambda i: (0, 0)
    out = pl.pallas_call(
        _esa_smi_kernel,
        out_shape=jax.ShapeDtypeStruct((B, Dpad), x.dtype),
        grid=(B,),
        in_specs=[
            pl.BlockSpec((1, N, C), lambda i: (i, 0, 0)),
            pl.BlockSpec((1, C), cst), pl.BlockSpec((1, C), cst),
            pl.BlockSpec((C, D), cst), pl.BlockSpec((1, D), cst),
            pl.BlockSpec((D, D), cst), pl.BlockSpec((1, D), cst),
            pl.BlockSpec((D, Dpad), cst), pl.BlockSpec((1, Dpad), cst),
        ],
        out_specs=pl.BlockSpec((1, Dpad), lambda i: (i, 0)),
        compiler_params=pltpu.CompilerParams(
            dimension_semantics=("parallel",),
            vmem_limit_bytes=32 * 1024 * 1024),
    )(x, p["ln_g"].reshape(1, C), p["ln_b"].reshape(1, C),
      p["w"], p["b"].reshape(1, D), p["w1"], p["b1"].reshape(1, D),
      pw, pb.reshape(1, Dpad))
    return out[:, :Dout]


# ----------------------------------------------------------------------------
# Plain-JAX glue (fourier features, gathers, scatter-add, BN stats, packing)
# ----------------------------------------------------------------------------


def fourier_embed(mz, freqs, d):
    freq_input = jnp.einsum("bi,j->bij", mz, freqs)
    emb = jnp.concatenate([jnp.sin(freq_input), jnp.cos(freq_input)], -1)
    return emb[:, :, :d]


def ms_branch(mzs, intens, num_peaks, p, esa, proj_w, proj_b):
    d = p["spec_embed_dim"]
    emb = fourier_embed(mzs, p["freqs"], d)                       # (B, P, d)
    B, P, _ = emb.shape
    Kp = ((d + 1 + 7) // 8) * 8                                   # pad contraction dim
    peak = jnp.concatenate(
        [emb, intens[:, :, None], jnp.zeros((B, P, Kp - d - 1), emb.dtype)], -1)
    return pallas_ms_branch(peak, num_peaks, p, esa, proj_w, proj_b)


def smiles_model(x, edge_index, edge_attr, p):
    # embedding gathers + scatter-add message passing stay in JAX (data-dependent)
    h = (p["x_emb1"][x[:, 0]] + p["x_emb2"][x[:, 1]] + p["x_emb3"][x[:, 2]]
         + p["x_emb4"][x[:, 3]] + p["x_emb5"][x[:, 4]])
    n = x.shape[0]
    nl = len(p["layers"])
    self_idx = jnp.arange(n, dtype=edge_index.dtype)
    src = jnp.concatenate([edge_index[0], self_idx])
    dst = jnp.concatenate([edge_index[1], self_idx])
    for li, lp in enumerate(p["layers"]):
        # GINEConv (aggr="add") with added self-loops
        sl_attr = jnp.zeros((n, 2), dtype=edge_attr.dtype).at[:, 0].set(4)
        ea = jnp.concatenate([edge_attr, sl_attr], axis=0)
        edge_emb = lp["edge_emb1"][ea[:, 0]] + lp["edge_emb2"][ea[:, 1]]
        msg = h[src] + edge_emb
        aggr = jnp.zeros_like(h).at[dst].add(msg)
        h = pallas_gine_mlp(aggr, lp["mlp_w1"], lp["mlp_b1"],
                            lp["mlp_w2"], lp["mlp_b2"])
        # BatchNorm1d (training mode -> batch statistics, biased var, eps=1e-5)
        # computed in plain JAX so the MLP kernel can be M-tiled/parallel.
        mu = jnp.mean(h, axis=0, keepdims=True)
        var = jnp.mean((h - mu) ** 2, axis=0, keepdims=True)
        h = (h - mu) * jax.lax.rsqrt(var + 1e-5) * lp["bn_g"][None, :] \
            + lp["bn_b"][None, :]
        if li != nl - 1:
            h = jnp.maximum(h, 0.0)
        # F.dropout with drop_ratio=0 is identity
    return h


def pack_by_batch(h, batch_np):
    # reproduces: result[i, :len(indices), :] = hidden_states[indices]
    B = int(batch_np.max()) + 1
    counts = np.bincount(batch_np)
    N = int(counts.max())
    pos = np.zeros_like(batch_np)
    counters = np.zeros(B, dtype=np.int64)
    for i, b in enumerate(batch_np):
        pos[i] = counters[b]
        counters[b] += 1
    result = jnp.zeros((B, N, h.shape[1]), dtype=h.dtype)
    result = result.at[jnp.asarray(batch_np), jnp.asarray(pos)].set(h)
    return result


def model_clr_forward(params, x, edge_index, edge_attr, batch_np, mzs, intens,
                      num_peaks):
    zis = smiles_model(x, edge_index, edge_attr, params["smiles"])
    packed = pack_by_batch(zis, batch_np)
    zis_feat = pallas_esa_smi_proj(packed, params["smi_esa"],
                                   params["smi_proj_w"], params["smi_proj_b"])
    zls_feat = ms_branch(mzs, intens, num_peaks, params["ms"],
                         params["spec_esa"],
                         params["spec_proj_w"], params["spec_proj_b"])
    return zis_feat, zls_feat


# ----------------------------------------------------------------------------
# Deterministic parameter construction
# ----------------------------------------------------------------------------


def _glorot(key, shape):
    limit = math.sqrt(6.0 / (shape[0] + shape[1]))
    return jax.random.uniform(key, shape, jnp.float32, -limit, limit)


def init_params(key, num_layer, emb_dim, spec_embed_dim, layers, embed_dim, nhead=8):
    keys = iter(jax.random.split(key, 256))
    f32 = jnp.float32

    def lin(k_in, k_out):
        return _glorot(next(keys), (k_in, k_out)), jnp.zeros((k_out,), f32)

    # SmilesModel
    smiles = {
        "x_emb1": _glorot(next(keys), (119, emb_dim)),
        "x_emb2": _glorot(next(keys), (4, emb_dim)),
        "x_emb3": _glorot(next(keys), (8, emb_dim)),
        "x_emb4": _glorot(next(keys), (6, emb_dim)),
        "x_emb5": _glorot(next(keys), (5, emb_dim)),
        "layers": [],
    }
    for _ in range(num_layer):
        w1, b1 = lin(emb_dim, 2 * emb_dim)
        w2, b2 = lin(2 * emb_dim, emb_dim)
        smiles["layers"].append({
            "edge_emb1": _glorot(next(keys), (5, emb_dim)),
            "edge_emb2": _glorot(next(keys), (3, emb_dim)),
            "mlp_w1": w1, "mlp_b1": b1, "mlp_w2": w2, "mlp_b2": b2,
            "bn_g": jnp.ones((emb_dim,), f32), "bn_b": jnp.zeros((emb_dim,), f32),
        })

    # MSModel
    d = spec_embed_dim
    lambda_min = 10.0 ** 2.5
    lambda_max = 10.0 ** 3.3
    index = jnp.arange(math.ceil(d / 2), dtype=f32)
    expo = (lambda_max / lambda_min) ** (2.0 * index / (d - 2))
    freqs = 2.0 * np.pi / (lambda_min * expo)
    comp_w, comp_b = lin(d + 1, d)
    ms = {"spec_embed_dim": d, "nhead": nhead, "freqs": freqs,
          "comp_w": comp_w, "comp_b": comp_b, "layers": []}
    for _ in range(layers):
        in_w, in_b = lin(d, 3 * d)
        out_w, out_b = lin(d, d)
        ff1_w, ff1_b = lin(d, 4 * d)
        ff2_w, ff2_b = lin(4 * d, d)
        ms["layers"].append({
            "in_w": in_w, "in_b": in_b, "out_w": out_w, "out_b": out_b,
            "ff1_w": ff1_w, "ff1_b": ff1_b, "ff2_w": ff2_w, "ff2_b": ff2_b,
            "n1_g": jnp.ones((d,), f32), "n1_b": jnp.zeros((d,), f32),
            "n2_g": jnp.ones((d,), f32), "n2_b": jnp.zeros((d,), f32),
        })

    def esa(feature_dim, out_dim):
        w, b = lin(feature_dim, out_dim)
        w1, b1 = lin(out_dim, out_dim)
        return {"ln_g": jnp.ones((feature_dim,), f32),
                "ln_b": jnp.zeros((feature_dim,), f32),
                "w": w, "b": b, "w1": w1, "b1": b1}

    smi_proj_w, smi_proj_b = lin(embed_dim, embed_dim)
    spec_proj_w, spec_proj_b = lin(embed_dim, embed_dim)

    return {
        "smiles": smiles,
        "ms": ms,
        "smi_esa": esa(emb_dim, embed_dim),
        "spec_esa": esa(spec_embed_dim, embed_dim),
        "smi_proj_w": smi_proj_w, "smi_proj_b": smi_proj_b,
        "spec_proj_w": spec_proj_w, "spec_proj_b": spec_proj_b,
    }


# ----------------------------------------------------------------------------
# Example run
# ----------------------------------------------------------------------------

if __name__ == "__main__":
    # Hyperparameters (small, consistent with the module)
    num_layer = 2
    emb_dim = 32
    feat_dim = 32          # unused in forward (feat_lin/out_lin are commented out)
    drop_ratio = 0.0
    spec_embed_dim = 32
    dropout = 0.0
    n_attn_layers = 1
    embed_dim = 16

    key = jax.random.PRNGKey(0)
    kp, kx, ke, km, ki = jax.random.split(key, 5)

    params = init_params(kp, num_layer, emb_dim, spec_embed_dim, n_attn_layers,
                         embed_dim)

    # Graph input (PyG-style): 10 nodes, 2 graphs (6 + 4 nodes)
    num_nodes = 10
    node_feat_max = jnp.array([119, 4, 8, 6, 5], dtype=jnp.int32)
    x = jax.random.randint(kx, (num_nodes, 5), 0, 1_000_000,
                           dtype=jnp.int32) % node_feat_max
    edge_index = jnp.array([[0, 1, 1, 2, 2, 3, 4, 5, 6, 7, 8, 9],
                            [1, 0, 2, 1, 3, 2, 5, 4, 7, 6, 9, 8]], dtype=jnp.int32)
    edge_attr = jax.random.randint(ke, (edge_index.shape[1], 2), 0, 1_000_000,
                                   dtype=jnp.int32) % jnp.array([5, 3],
                                                                dtype=jnp.int32)
    batch_np = np.array([0, 0, 0, 0, 0, 0, 1, 1, 1, 1], dtype=np.int64)

    # Spectrum input: batch=2, max 8 peaks
    B, P = 2, 8
    mzs = jax.random.uniform(km, (B, P), jnp.float32, 10.0, 500.0)
    intens = jax.random.uniform(ki, (B, P), jnp.float32, 0.0, 1.0)
    num_peaks = jnp.array([6, 8], dtype=jnp.int32)

    zis_feat, zls_feat = model_clr_forward(
        params, x, edge_index, edge_attr, batch_np, mzs, intens, num_peaks)
    jax.block_until_ready((zis_feat, zls_feat))

    assert zis_feat.shape == (2, embed_dim) and zls_feat.shape == (2, embed_dim)
    assert bool(jnp.all(jnp.isfinite(zis_feat))) and bool(jnp.all(jnp.isfinite(zls_feat)))
    print("KERNEL_OK")
</pallas_src>

<mosaic_0001>
module attributes {stable_mosaic.version = 11 : i64} {
  func.func @_gine_mlp_kernel(%arg0: i32, %arg1: memref<10x32xf32, #tpu.memory_space<vmem>>, %arg2: memref<32x64xf32, #tpu.memory_space<vmem>>, %arg3: memref<1x64xf32, #tpu.memory_space<vmem>>, %arg4: memref<64x32xf32, #tpu.memory_space<vmem>>, %arg5: memref<1x32xf32, #tpu.memory_space<vmem>>, %arg6: memref<10x32xf32, #tpu.memory_space<vmem>>) attributes {dimension_semantics = [#tpu.dimension_semantics<parallel>], iteration_bounds = array<i64: 1>, scalar_prefetch = 0 : i64, scratch_operands = 0 : i64, tpu.core_type = #tpu.core_type<tc>, window_params = [{transform_indices = @transform_0, window_bounds = array<i64: 10, 32>}, {pipeline_mode = #tpu.pipeline_mode<synchronous>, transform_indices = @transform_1, window_bounds = array<i64: 32, 64>}, {pipeline_mode = #tpu.pipeline_mode<synchronous>, transform_indices = @transform_2, window_bounds = array<i64: 1, 64>}, {pipeline_mode = #tpu.pipeline_mode<synchronous>, transform_indices = @transform_3, window_bounds = array<i64: 64, 32>}, {pipeline_mode = #tpu.pipeline_mode<synchronous>, transform_indices = @transform_4, window_bounds = array<i64: 1, 32>}, {transform_indices = @transform_5, window_bounds = array<i64: 10, 32>}]} {
    %c0 = arith.constant 0 : index
    %c0_0 = arith.constant 0 : index
    %0 = vector.load %arg1[%c0, %c0_0] : memref<10x32xf32, #tpu.memory_space<vmem>>, vector<10x32xf32>
    %c0_1 = arith.constant 0 : index
    %c0_2 = arith.constant 0 : index
    %1 = vector.load %arg2[%c0_1, %c0_2] : memref<32x64xf32, #tpu.memory_space<vmem>>, vector<32x64xf32>
    %cst = arith.constant dense<0.000000e+00> : vector<10x64xf32>
    %2 = tpu.matmul %0, %1, %cst {dimension_numbers = #tpu.dot_dimension_numbers<[1], [0], [0], [1], [0, 0, 1, 1], [], []>} : vector<10x32xf32>, vector<32x64xf32>, vector<10x64xf32> -> vector<10x64xf32>
    %c0_3 = arith.constant 0 : index
    %c0_4 = arith.constant 0 : index
    %3 = vector.load %arg3[%c0_3, %c0_4] : memref<1x64xf32, #tpu.memory_space<vmem>>, vector<1x64xf32>
    %4 = vector.broadcast %3 : vector<1x64xf32> to vector<10x64xf32>
    %5 = arith.addf %2, %4 : vector<10x64xf32>
    %cst_5 = arith.constant 0.000000e+00 : f32
    %6 = vector.broadcast %cst_5 : f32 to vector<10x64xf32>
    %7 = arith.maximumf %5, %6 : vector<10x64xf32>
    %c0_6 = arith.constant 0 : index
    %c0_7 = arith.constant 0 : index
    %8 = vector.load %arg4[%c0_6, %c0_7] : memref<64x32xf32, #tpu.memory_space<vmem>>, vector<64x32xf32>
    %cst_8 = arith.constant dense<0.000000e+00> : vector<10x32xf32>
    %9 = tpu.matmul %7, %8, %cst_8 {dimension_numbers = #tpu.dot_dimension_numbers<[1], [0], [0], [1], [0, 0, 1, 1], [], []>} : vector<10x64xf32>, vector<64x32xf32>, vector<10x32xf32> -> vector<10x32xf32>
    %c0_9 = arith.constant 0 : index
    %c0_10 = arith.constant 0 : index
    %10 = vector.load %arg5[%c0_9, %c0_10] : memref<1x32xf32, #tpu.memory_space<vmem>>, vector<1x32xf32>
    %11 = vector.broadcast %10 : vector<1x32xf32> to vector<10x32xf32>
    %12 = arith.addf %9, %11 : vector<10x32xf32>
    %c0_11 = arith.constant 0 : index
    %c0_12 = arith.constant 0 : index
    %13 = vector.load %arg6[%c0_11, %c0_12] : memref<10x32xf32, #tpu.memory_space<vmem>>, vector<10x32xf32>
    tpu.vector_store %arg6[%c0_11, %c0_12], %12 {strides = array<i32>} : memref<10x32xf32, #tpu.memory_space<vmem>>, vector<10x32xf32>,
    return
  }
  func.func @transform_0(%arg0: i32) -> (i32, i32) {
    %c0_i32 = arith.constant 0 : i32
    %c0_i32_0 = arith.constant 0 : i32
    return %arg0, %c0_i32 : i32, i32
  }
  func.func @transform_1(%arg0: i32) -> (i32, i32) {
    %c0_i32 = arith.constant 0 : i32
    %c0_i32_0 = arith.constant 0 : i32
    %c0_i32_1 = arith.constant 0 : i32
    return %c0_i32, %c0_i32_0 : i32, i32
  }
  func.func @transform_2(%arg0: i32) -> (i32, i32) {
    %c0_i32 = arith.constant 0 : i32
    %c0_i32_0 = arith.constant 0 : i32
    %c0_i32_1 = arith.constant 0 : i32
    return %c0_i32, %c0_i32_0 : i32, i32
  }
  func.func @transform_3(%arg0: i32) -> (i32, i32) {
    %c0_i32 = arith.constant 0 : i32
    %c0_i32_0 = arith.constant 0 : i32
    %c0_i32_1 = arith.constant 0 : i32
    return %c0_i32, %c0_i32_0 : i32, i32
  }
  func.func @transform_4(%arg0: i32) -> (i32, i32) {
    %c0_i32 = arith.constant 0 : i32
    %c0_i32_0 = arith.constant 0 : i32
    %c0_i32_1 = arith.constant 0 : i32
    return %c0_i32, %c0_i32_0 : i32, i32
  }
  func.func @transform_5(%arg0: i32) -> (i32, i32) {
    %c0_i32 = arith.constant 0 : i32
    %c0_i32_0 = arith.constant 0 : i32
    return %arg0, %c0_i32 : i32, i32
  }
}

</mosaic_0001>

<bundles_post_ra>
// kernel: tpu_custom_call.1
= control target key start
LH: loop header
LB: loop body
LE: loop exit
PB: predicated region body
PF: predicated region fallthrough
CT: control target
= control target key end

     0   :  { %vm34_vm0 = vcmask 261120   ;;  %s433_s0 = inlined_call_operand.vmem [shape: f32[10,32], index: 0, kind: input, shape index: {}]   ;;  %s434_s1 = inlined_call_operand.vmem [shape: f32[32,64], index: 1, kind: input, shape index: {}]   ;;  %s435_s2 = inlined_call_operand.vmem [shape: f32[1,64], index: 2, kind: input, shape index: {}]   ;;  %s436_s3 = inlined_call_operand.vmem [shape: f32[64,32], index: 3, kind: input, shape index: {}]   ;;  %s437_s4 = inlined_call_operand.vmem [shape: f32[1,32], index: 4, kind: input, shape index: {}]   ;;  %s438_s5 = inlined_call_operand.hbm [shape: f32[10,32], index: 5, kind: output, shape index: {}]  }
   0x1   :  { %v23_v0 = vld [vmem:[%s434_s1] sm:$0xff]  ;;  %v24_v1 = vld [vmem:[%s434_s1 + $0x8] sm:$0xff]  ;;  %v25_v2 = vld [vmem:[%s434_s1 + $0x10] sm:$0xff] }
   0x2   :  { %v286_v3 = vpack.c.bf16 %v24_v1, %v23_v0  ;;  %v26_v4 = vld [vmem:[%s434_s1 + $0x18] sm:$0xff]  ;;  %v21_v5 = vld [vmem:[%s433_s0] sm:$0xff]  ;;  %v119_v8 = vld [vmem:[%s436_s3 + $0x8] sm:$0xff] }
   0x3   :  { %v290_v6 = vpack.c.bf16 %v26_v4, %v25_v2  ;;  %264 = vmatprep.mubr.msk.f32.mxu0 %vm34_vm0, %v21_v5  ;;  %v118_v7 = vld [vmem:[%s436_s3] sm:$0xff]  ;;  %v120_v9 = vld [vmem:[%s436_s3 + $0x10] sm:$0xff]  ;;  %v121_v11 = vld [vmem:[%s436_s3 + $0x18] sm:$0xff] }
   0x4   :  { %287 = vmatprep.subr.bf16.mxu0 %v286_v3  ;;  %v294_v10 = vpack.c.bf16 %v119_v8, %v118_v7  ;;  %v298_v12 = vpack.c.bf16 %v121_v11, %v120_v9  ;;  %v122_v13 = vld [vmem:[%s436_s3 + $0x20] sm:$0xff]  ;;  %v123_v14 = vld [vmem:[%s436_s3 + $0x28] sm:$0xff] }
   0x5   :  { %289 = vmatpush3.bf16.msra.mxu0 %v286_v3 }
   0x6   :  { %10 = vsyncpa [#allocation3], 0  ;;  %291 = vmatprep.subr.bf16.mxu0 %v290_v6  ;;  %295 = vmatprep.subr.bf16.mxu1 %v294_v10  ;;  %v302_v15 = vpack.c.bf16 %v123_v14, %v122_v13  ;;  %v22_v16 = vld [vmem:[%s433_s0 + $0x8] sm:$0x3]  ;;  %v124_v17 = vld [vmem:[%s436_s3 + $0x30] sm:$0xff]  ;;  %vm133_vm1 = vcmask 523264  }
   0x7   :  { %297 = vmatpush3.bf16.msra.mxu1 %v294_v10  ;;  %v125_v18 = vld [vmem:[%s436_s3 + $0x38] sm:$0xff]  ;;  %v234_v20 = vld [vmem:[%s435_s2] ss:$0 sm:$0xff]  ;;  %s337_s3 = smov [#allocation2]   ;;  %vm216_vm2 = vcmask 254976  }
   0x8   :  { %299 = vmatprep.subr.bf16.mxu1 %v298_v12  ;;  %v306_v19 = vpack.c.bf16 %v125_v18, %v124_v17  ;;  %v237_v27 = vld [vmem:[%s437_s4] ss:$0 sm:$0xff]  ;;  %s223_s23 = sshll.u32 %s337_s3, 4  ;;  %s224_s23 = int_to_ptr.vmem [resolvable:$true] %s223_s23 }
   0x9   :  { %293 = vmatpush3.bf16.msra.mxu0 %v290_v6  ;;  %s313_s2 = scalar_lea.vmem %s224_s23, 256  ;;  %p318_p1 = scmp.lt.s32.totalorder %s224_s23, %s224_s23 }
   0xa   :  { %p314_p0 = scmp.ne.s32.totalorder %s224_s23, %s313_s2  ;;  %p319_p2 = scmp.lt.s32.totalorder %s313_s2, %s313_s2 }
   0xb   :  { %301 = vmatpush3.bf16.msra.mxu1 %v298_v12 }
   0xc   :  { %265 = vmatmul.mubr.msk.f32.vlgmr.msra.gmra.mrb[0].mxu0 %vm34_vm0, %v22_v16  ;;  %303 = vmatprep.subr.bf16.mxu1 %v302_v15  ;;  %p320_p3 = por %p319_p2, %p318_p1 }
   0xe   :  { %p321_p4 = pnand %p320_p3, %p314_p0 }
   0xf   :  { %305 = vmatpush3.bf16.msra.mxu1 %v302_v15 }
  0x10   :  { %307 = vmatprep.subr.bf16.mxu1 %v306_v19 }
  0x13   :  { %309 = vmatpush3.bf16.msra.mxu1 %v306_v19 }
  0xdf   :  { %v266_v21 = vpop.f32.mrb[0].mxu0 }
  0xe0   :  { %v113_v22 = vadd.f32 %v266_v21, %v234_v20  ;;  %v107_v23 = vpop.f32.mrb[1].mxu0 }
  0xe1   :  { %v108_v24 = vadd.f32 %v234_v20, %v107_v23 }
  0xe2   :  { %v117_v26 = vmax.f32 %v113_v22, 0.0 }
  0xe3   :  { %v116_v25 = vmax.f32 %v108_v24, 0.0 }
  0xe5   :  { %283 = vmatprep.mubr.msk.f32.mxu1 %vm133_vm1, %v116_v25 }
  0xe6   :  { %284 = vmatmul.mubr.msk.f32.vlgmr.msra.gmra.mrb[0].mxu1 %vm133_vm1, %v117_v26 }
 0x1b9   :  { %v285_v28 = vpop.f32.mrb[0].mxu1 }
 0x1ba   :  { %v212_v29 = vadd.f32 %v285_v28, %v237_v27  ;;  %v206_v30 = vpop.f32.mrb[1].mxu1 }
 0x1bb   :  { %v207_v31 = vadd.f32 %v237_v27, %v206_v30 }
 0x1bc   :  { %217 = vst.msk [vmem:[#allocation2 + $0x8] sm:$0x3] %vm216_vm2, %v212_v29 }
 0x1bd   :  { %215 = vst.msk [vmem:[#allocation2] sm:$0xff] %vm34_vm0, %v207_v31 }
 0x1be   :  { %324 = shalt.err (!%p321_p4)
}
 0x1bf   :  { %s325_s25 = scalar_lea.hbm %s438_s5, 256 }
 0x1c0   :  { %p326_p5 = scmp.ne.s32.totalorder %s438_s5, %s325_s25  ;;  %p329_p6 = scmp.lt.u32.totalorder %s325_s25, %s438_s5 }
 0x1c2   :  { %p331_p7 = pnand %p329_p6, %p326_p5 }
 0x1c4   :  { %334 = shalt.err (!%p331_p7)
}
 0x1c5   :  { %s338_s30 = smov 128   ;;  %s339_s6 = smov 8  }
 0x1c6   :  { %229 = dma.vmem_to_hbm [thread:$0]  %s224_s23, 256, %s438_s5, [#allocation3], %s338_s30, %s338_s30, %s339_s6  }
 0x1c7   :  { %335 = dma.done.wait [#allocation3], 256  }
 0x1c8   :  { %336 = vsyncadd [#allocation3], 4294967040 }
 0x1c9   :  { %233 = vsyncpa [#allocation3], 1 }

</bundles_post_ra>
